<compile_context>
chip_gen: v7x
topology: tpu7x:2x2x1
jax: 0.10.0
libtpu: 0.0.40
codegen_flags: <defaults>
</compile_context>

<pallas_src>
import jax
import jax.numpy as jnp
from jax.experimental import pallas as pl
from jax.experimental.pallas import tpu as pltpu

LANE = 128          # TPU lane width: feature dims padded to multiples of this
MAX_TILE_B = 512    # batch-tile cap; small enough for 64 MiB VMEM (v7x), big enough to pipeline


def _round_up(x, m):
    return (x + m - 1) // m * m


def qnetwork_kernel(x_ref, w1_ref, b1_ref, w2_ref, b2_ref, w3_ref, b3_ref, o_ref):
    """One batch tile of the fused 3-layer MLP.

    Matmuls run on the MXU with bf16 inputs and f32 accumulation; the
    bias-add / ReLU epilogue stays in f32 (no implicit bf16 VPU ops on v5e).
    """
    x = x_ref[...]                                                    # (TILE_B, OBS_PAD) bf16
    h1 = jnp.dot(x, w1_ref[...], preferred_element_type=jnp.float32) + b1_ref[...]
    h1 = jnp.maximum(h1, 0.0)
    h2 = jnp.dot(h1.astype(w2_ref.dtype), w2_ref[...],
                 preferred_element_type=jnp.float32) + b2_ref[...]
    h2 = jnp.maximum(h2, 0.0)
    q = jnp.dot(h2.astype(w3_ref.dtype), w3_ref[...],
                preferred_element_type=jnp.float32) + b3_ref[...]
    o_ref[...] = q.astype(o_ref.dtype)                                # lane-dense 128-wide store


@jax.jit
def qnetwork_forward(x, w1, b1, w2, b2, w3, b3):
    B, obs_dim = x.shape
    hid_dim = w1.shape[1]
    act_dim = w3.shape[1]

    obs_pad = _round_up(obs_dim, LANE)
    act_pad = _round_up(act_dim, LANE)
    tile_b = min(MAX_TILE_B, _round_up(B, 8))
    b_pad = _round_up(B, tile_b)

    mm_dtype = jnp.bfloat16  # MXU-native matmul-input dtype on v6e/v7x

    # One-time layout prep (outside the kernel, outside the grid loop):
    # zero-pad to lane-aligned shapes, cast matmul operands to bf16.
    # Padded weight/bias columns are zero, so sliced output is exact.
    xp = jnp.zeros((b_pad, obs_pad), mm_dtype).at[:B, :obs_dim].set(x.astype(mm_dtype))
    w1p = jnp.zeros((obs_pad, hid_dim), mm_dtype).at[:obs_dim, :].set(w1.astype(mm_dtype))
    w2p = w2.astype(mm_dtype)
    w3p = jnp.zeros((hid_dim, act_pad), mm_dtype).at[:, :act_dim].set(w3.astype(mm_dtype))
    b1p = b1.astype(jnp.float32)
    b2p = b2.astype(jnp.float32)
    b3p = jnp.zeros((1, act_pad), jnp.float32).at[:, :act_dim].set(b3.astype(jnp.float32))

    grid = (b_pad // tile_b,)
    tiled = lambda shape: pl.BlockSpec(shape, lambda i: (i, 0))        # moves with batch tile
    resident = lambda shape: pl.BlockSpec(shape, lambda i: (0, 0))     # VMEM-resident weights

    flops = 2 * b_pad * (obs_pad * hid_dim + hid_dim * hid_dim + hid_dim * act_pad)
    bytes_accessed = (
        xp.size * 2 + w1p.size * 2 + w2p.size * 2 + w3p.size * 2
        + (b1p.size + b2p.size + b3p.size) * 4
        + b_pad * act_pad * 4
    )

    q = pl.pallas_call(
        qnetwork_kernel,
        out_shape=jax.ShapeDtypeStruct((b_pad, act_pad), jnp.float32),
        grid=grid,
        in_specs=[
            tiled((tile_b, obs_pad)),
            resident((obs_pad, hid_dim)), resident((1, hid_dim)),
            resident((hid_dim, hid_dim)), resident((1, hid_dim)),
            resident((hid_dim, act_pad)), resident((1, act_pad)),
        ],
        out_specs=tiled((tile_b, act_pad)),
        compiler_params=pltpu.CompilerParams(
            dimension_semantics=("parallel",),   # megacore split of batch tiles on v7x
        ),
        cost_estimate=pl.CostEstimate(
            flops=flops, transcendentals=0, bytes_accessed=bytes_accessed),
    )(xp, w1p, b1p, w2p, b2p, w3p, b3p)

    return q[:B, :act_dim]


def init_params(key, obs_dim, hid_dim, act_dim):
    """Deterministic synthetic params, PyTorch nn.Linear-style uniform init."""
    ks = jax.random.split(key, 6)

    def linear(kw, kb, fan_in, fan_out):
        bound = 1.0 / jnp.sqrt(fan_in)
        w = jax.random.uniform(kw, (fan_in, fan_out), jnp.float32, -bound, bound)
        b = jax.random.uniform(kb, (1, fan_out), jnp.float32, -bound, bound)
        return w, b

    w1, b1 = linear(ks[0], ks[1], obs_dim, hid_dim)
    w2, b2 = linear(ks[2], ks[3], hid_dim, hid_dim)
    w3, b3 = linear(ks[4], ks[5], hid_dim, act_dim)
    return w1, b1, w2, b2, w3, b3


def reference_forward_f32(x, w1, b1, w2, b2, w3, b3):
    h1 = jnp.maximum(x @ w1 + b1, 0.0)
    h2 = jnp.maximum(h1 @ w2 + b2, 0.0)
    return h2 @ w3 + b3


def reference_forward_bf16(x, w1, b1, w2, b2, w3, b3):
    """JAX reference mirroring the kernel's numerics (bf16 matmul inputs, f32 acc)."""
    bf = jnp.bfloat16
    dot = lambda a, b: jnp.dot(a.astype(bf), b.astype(bf),
                               preferred_element_type=jnp.float32)
    h1 = jnp.maximum(dot(x, w1) + b1, 0.0)
    h2 = jnp.maximum(dot(h1, w2) + b2, 0.0)
    return dot(h2, w3) + b3


if __name__ == "__main__":
    obs_dim, act_dim, hid_dim = 32, 8, 128
    batch = 8

    key = jax.random.PRNGKey(0)
    k_x, k_p = jax.random.split(key)
    x = jax.random.normal(k_x, (batch, obs_dim), jnp.float32)
    params = init_params(k_p, obs_dim, hid_dim, act_dim)

    q = qnetwork_forward(x, *params)
    jax.block_until_ready(q)

    assert q.shape == (batch, act_dim)

    q_ref_bf16 = reference_forward_bf16(x, *params)
    q_ref_f32 = reference_forward_f32(x, *params)
    assert jnp.allclose(q, q_ref_bf16, atol=2e-3, rtol=2e-3), "mismatch vs bf16 JAX reference"
    assert jnp.allclose(q, q_ref_f32, atol=5e-2, rtol=5e-2), "mismatch vs f32 JAX reference"

    print("KERNEL_OK")
</pallas_src>

<mosaic_0001>
module attributes {stable_mosaic.version = 11 : i64} {
  func.func @qnetwork_kernel(%arg0: i32, %arg1: memref<8x128xbf16, #tpu.memory_space<vmem>>, %arg2: memref<128x128xbf16, #tpu.memory_space<vmem>>, %arg3: memref<1x128xf32, #tpu.memory_space<vmem>>, %arg4: memref<128x128xbf16, #tpu.memory_space<vmem>>, %arg5: memref<1x128xf32, #tpu.memory_space<vmem>>, %arg6: memref<128x128xbf16, #tpu.memory_space<vmem>>, %arg7: memref<1x128xf32, #tpu.memory_space<vmem>>, %arg8: memref<8x128xf32, #tpu.memory_space<vmem>>) attributes {dimension_semantics = [#tpu.dimension_semantics<parallel>], iteration_bounds = array<i64: 1>, scalar_prefetch = 0 : i64, scratch_operands = 0 : i64, tpu.core_type = #tpu.core_type<tc>, window_params = [{transform_indices = @transform_0, window_bounds = array<i64: 8, 128>}, {pipeline_mode = #tpu.pipeline_mode<synchronous>, transform_indices = @transform_1, window_bounds = array<i64: 128, 128>}, {pipeline_mode = #tpu.pipeline_mode<synchronous>, transform_indices = @transform_2, window_bounds = array<i64: 1, 128>}, {pipeline_mode = #tpu.pipeline_mode<synchronous>, transform_indices = @transform_3, window_bounds = array<i64: 128, 128>}, {pipeline_mode = #tpu.pipeline_mode<synchronous>, transform_indices = @transform_4, window_bounds = array<i64: 1, 128>}, {pipeline_mode = #tpu.pipeline_mode<synchronous>, transform_indices = @transform_5, window_bounds = array<i64: 128, 128>}, {pipeline_mode = #tpu.pipeline_mode<synchronous>, transform_indices = @transform_6, window_bounds = array<i64: 1, 128>}, {transform_indices = @transform_7, window_bounds = array<i64: 8, 128>}]} {
    %c0 = arith.constant 0 : index
    %c0_0 = arith.constant 0 : index
    %0 = vector.load %arg1[%c0, %c0_0] : memref<8x128xbf16, #tpu.memory_space<vmem>>, vector<8x128xbf16>
    %c0_1 = arith.constant 0 : index
    %c0_2 = arith.constant 0 : index
    %1 = vector.load %arg2[%c0_1, %c0_2] : memref<128x128xbf16, #tpu.memory_space<vmem>>, vector<128x128xbf16>
    %cst = arith.constant dense<0.000000e+00> : vector<8x128xf32>
    %2 = tpu.matmul %0, %1, %cst {dimension_numbers = #tpu.dot_dimension_numbers<[1], [0], [0], [1], [0, 0, 1, 1], [], []>} : vector<8x128xbf16>, vector<128x128xbf16>, vector<8x128xf32> -> vector<8x128xf32>
    %c0_3 = arith.constant 0 : index
    %c0_4 = arith.constant 0 : index
    %3 = vector.load %arg3[%c0_3, %c0_4] : memref<1x128xf32, #tpu.memory_space<vmem>>, vector<1x128xf32>
    %4 = vector.broadcast %3 : vector<1x128xf32> to vector<8x128xf32>
    %5 = arith.addf %2, %4 : vector<8x128xf32>
    %cst_5 = arith.constant 0.000000e+00 : f32
    %6 = vector.broadcast %cst_5 : f32 to vector<8x128xf32>
    %7 = arith.maximumf %5, %6 : vector<8x128xf32>
    %8 = arith.truncf %7 : vector<8x128xf32> to vector<8x128xbf16>
    %c0_6 = arith.constant 0 : index
    %c0_7 = arith.constant 0 : index
    %9 = vector.load %arg4[%c0_6, %c0_7] : memref<128x128xbf16, #tpu.memory_space<vmem>>, vector<128x128xbf16>
    %cst_8 = arith.constant dense<0.000000e+00> : vector<8x128xf32>
    %10 = tpu.matmul %8, %9, %cst_8 {dimension_numbers = #tpu.dot_dimension_numbers<[1], [0], [0], [1], [0, 0, 1, 1], [], []>} : vector<8x128xbf16>, vector<128x128xbf16>, vector<8x128xf32> -> vector<8x128xf32>
    %c0_9 = arith.constant 0 : index
    %c0_10 = arith.constant 0 : index
    %11 = vector.load %arg5[%c0_9, %c0_10] : memref<1x128xf32, #tpu.memory_space<vmem>>, vector<1x128xf32>
    %12 = vector.broadcast %11 : vector<1x128xf32> to vector<8x128xf32>
    %13 = arith.addf %10, %12 : vector<8x128xf32>
    %cst_11 = arith.constant 0.000000e+00 : f32
    %14 = vector.broadcast %cst_11 : f32 to vector<8x128xf32>
    %15 = arith.maximumf %13, %14 : vector<8x128xf32>
    %16 = arith.truncf %15 : vector<8x128xf32> to vector<8x128xbf16>
    %c0_12 = arith.constant 0 : index
    %c0_13 = arith.constant 0 : index
    %17 = vector.load %arg6[%c0_12, %c0_13] : memref<128x128xbf16, #tpu.memory_space<vmem>>, vector<128x128xbf16>
    %cst_14 = arith.constant dense<0.000000e+00> : vector<8x128xf32>
    %18 = tpu.matmul %16, %17, %cst_14 {dimension_numbers = #tpu.dot_dimension_numbers<[1], [0], [0], [1], [0, 0, 1, 1], [], []>} : vector<8x128xbf16>, vector<128x128xbf16>, vector<8x128xf32> -> vector<8x128xf32>
    %c0_15 = arith.constant 0 : index
    %c0_16 = arith.constant 0 : index
    %19 = vector.load %arg7[%c0_15, %c0_16] : memref<1x128xf32, #tpu.memory_space<vmem>>, vector<1x128xf32>
    %20 = vector.broadcast %19 : vector<1x128xf32> to vector<8x128xf32>
    %21 = arith.addf %18, %20 : vector<8x128xf32>
    %c0_17 = arith.constant 0 : index
    %c0_18 = arith.constant 0 : index
    %22 = vector.load %arg8[%c0_17, %c0_18] : memref<8x128xf32, #tpu.memory_space<vmem>>, vector<8x128xf32>
    tpu.vector_store %arg8[%c0_17, %c0_18], %21 {strides = array<i32>} : memref<8x128xf32, #tpu.memory_space<vmem>>, vector<8x128xf32>,
    return
  }
  func.func @transform_0(%arg0: i32) -> (i32, i32) {
    %c0_i32 = arith.constant 0 : i32
    %c0_i32_0 = arith.constant 0 : i32
    return %arg0, %c0_i32 : i32, i32
  }
  func.func @transform_1(%arg0: i32) -> (i32, i32) {
    %c0_i32 = arith.constant 0 : i32
    %c0_i32_0 = arith.constant 0 : i32
    %c0_i32_1 = arith.constant 0 : i32
    return %c0_i32, %c0_i32_0 : i32, i32
  }
  func.func @transform_2(%arg0: i32) -> (i32, i32) {
    %c0_i32 = arith.constant 0 : i32
    %c0_i32_0 = arith.constant 0 : i32
    %c0_i32_1 = arith.constant 0 : i32
    return %c0_i32, %c0_i32_0 : i32, i32
  }
  func.func @transform_3(%arg0: i32) -> (i32, i32) {
    %c0_i32 = arith.constant 0 : i32
    %c0_i32_0 = arith.constant 0 : i32
    %c0_i32_1 = arith.constant 0 : i32
    return %c0_i32, %c0_i32_0 : i32, i32
  }
  func.func @transform_4(%arg0: i32) -> (i32, i32) {
    %c0_i32 = arith.constant 0 : i32
    %c0_i32_0 = arith.constant 0 : i32
    %c0_i32_1 = arith.constant 0 : i32
    return %c0_i32, %c0_i32_0 : i32, i32
  }
  func.func @transform_5(%arg0: i32) -> (i32, i32) {
    %c0_i32 = arith.constant 0 : i32
    %c0_i32_0 = arith.constant 0 : i32
    %c0_i32_1 = arith.constant 0 : i32
    return %c0_i32, %c0_i32_0 : i32, i32
  }
  func.func @transform_6(%arg0: i32) -> (i32, i32) {
    %c0_i32 = arith.constant 0 : i32
    %c0_i32_0 = arith.constant 0 : i32
    %c0_i32_1 = arith.constant 0 : i32
    return %c0_i32, %c0_i32_0 : i32, i32
  }
  func.func @transform_7(%arg0: i32) -> (i32, i32) {
    %c0_i32 = arith.constant 0 : i32
    %c0_i32_0 = arith.constant 0 : i32
    return %arg0, %c0_i32 : i32, i32
  }
}

</mosaic_0001>

<bundles_post_ra>
// kernel: qnetwork_forward.1
= control target key start
LH: loop header
LB: loop body
LE: loop exit
PB: predicated region body
PF: predicated region fallthrough
CT: control target
= control target key end

     0   :  { %v546_v1 = vmov 0.0   ;;  %vm547_vm0 = vmmov 0   ;;  %s715_s0 = inlined_call_operand.vmem [shape: bf16[8,128], index: 0, kind: input, shape index: {}]   ;;  %s716_s1 = inlined_call_operand.vmem [shape: bf16[128,128], index: 1, kind: input, shape index: {}]   ;;  %s717_s2 = inlined_call_operand.vmem [shape: f32[1,128], index: 2, kind: input, shape index: {}]   ;;  %s718_s3 = inlined_call_operand.vmem [shape: bf16[128,128], index: 3, kind: input, shape index: {}]   ;;  %s719_s4 = inlined_call_operand.vmem [shape: f32[1,128], index: 4, kind: input, shape index: {}]   ;;  %s720_s5 = inlined_call_operand.vmem [shape: bf16[128,128], index: 5, kind: input, shape index: {}]   ;;  %s721_s6 = inlined_call_operand.vmem [shape: f32[1,128], index: 6, kind: input, shape index: {}]   ;;  %s722_s7 = inlined_call_operand.hbm [shape: f32[8,128], index: 7, kind: output, shape index: {}]  }
   0x1   :  { %v498_v0 = vld [vmem:[%s716_s1] sm:$0xff]   ;;  %435 = vmatprep.subr.bf16.mxu0 %v546_v1  ;;  %455 = vmatprep.subr.bf16.mxu1 %v546_v1  ;;  %v499_v2 = vld [vmem:[%s716_s1 + $0x8] sm:$0xff]   ;;  %v500_v3 = vld [vmem:[%s716_s1 + $0x10] sm:$0xff]  }
   0x2   :  { %436 = vmatpush3.bf16.msra.mxu0 %v498_v0  ;;  %451 = vmatprep.mubr.msk.bf16.mxu0 %vm547_vm0, %v546_v1  ;;  %v506_v4 = vld [vmem:[%s718_s3] sm:$0xff]   ;;  %v501_v5 = vld [vmem:[%s716_s1 + $0x18] sm:$0xff]   ;;  %v507_v6 = vld [vmem:[%s718_s3 + $0x8] sm:$0xff]  }
   0x3   :  { %437 = vmatprep.subr.bf16.mxu0 %v546_v1  ;;  %471 = vmatprep.mubr.msk.bf16.mxu1 %vm547_vm0, %v546_v1  ;;  %v502_v7 = vld [vmem:[%s716_s1 + $0x20] sm:$0xff]   ;;  %v508_v8 = vld [vmem:[%s718_s3 + $0x10] sm:$0xff]   ;;  %v503_v9 = vld [vmem:[%s716_s1 + $0x28] sm:$0xff]  }
   0x4   :  { %456 = vmatpush3.bf16.msra.mxu1 %v506_v4  ;;  %v509_v10 = vld [vmem:[%s718_s3 + $0x18] sm:$0xff]  }
   0x5   :  { %457 = vmatprep.subr.bf16.mxu1 %v546_v1 }
   0x6   :  { %438 = vmatpush3.bf16.msra.mxu0 %v499_v2 }
   0x7   :  { %439 = vmatprep.subr.bf16.mxu0 %v546_v1 }
   0x8   :  { %458 = vmatpush3.bf16.msra.mxu1 %v507_v6 }
   0x9   :  { %459 = vmatprep.subr.bf16.mxu1 %v546_v1 }
   0xa   :  { %440 = vmatpush3.bf16.msra.mxu0 %v500_v3 }
   0xb   :  { %441 = vmatprep.subr.bf16.mxu0 %v546_v1 }
   0xc   :  { %460 = vmatpush3.bf16.msra.mxu1 %v508_v8 }
   0xd   :  { %461 = vmatprep.subr.bf16.mxu1 %v546_v1 }
   0xe   :  { %442 = vmatpush3.bf16.msra.mxu0 %v501_v5 }
   0xf   :  { %443 = vmatprep.subr.bf16.mxu0 %v546_v1 }
  0x12   :  { %444 = vmatpush3.bf16.msra.mxu0 %v502_v7 }
  0x13   :  { %445 = vmatprep.subr.bf16.mxu0 %v546_v1 }
  0x14   :  { %12 = vsyncpa [#allocation3], 0  ;;  %v504_v11 = vld [vmem:[%s716_s1 + $0x30] sm:$0xff]   ;;  %462 = vmatpush3.bf16.msra.mxu1 %v509_v10  ;;  %v510_v12 = vld [vmem:[%s718_s3 + $0x20] sm:$0xff]   ;;  %s548_s30 = smov [#allocation2]  }
  0x15   :  { %463 = vmatprep.subr.bf16.mxu1 %v546_v1  ;;  %v505_v13 = vld [vmem:[%s716_s1 + $0x38] sm:$0xff]   ;;  %v511_v14 = vld [vmem:[%s718_s3 + $0x28] sm:$0xff]   ;;  %v28_v15 = vld [vmem:[%s715_s0] sm:$0xf]  ;;  %s373_s1 = sshll.u32 %s548_s30, 4  ;;  %s374_s1 = int_to_ptr.vmem [resolvable:$true] %s373_s1 }
  0x16   :  { %446 = vmatpush3.bf16.msra.mxu0 %v503_v9  ;;  %v512_v16 = vld [vmem:[%s718_s3 + $0x30] sm:$0xff]   ;;  %v513_v17 = vld [vmem:[%s718_s3 + $0x38] sm:$0xff]   ;;  %v514_v18 = vld [vmem:[%s720_s5] sm:$0xff]   ;;  %p527_p1 = scmp.lt.s32.totalorder %s374_s1, %s374_s1 }
  0x17   :  { %447 = vmatprep.subr.bf16.mxu0 %v546_v1  ;;  %v515_v19 = vld [vmem:[%s720_s5 + $0x8] sm:$0xff]   ;;  %v516_v20 = vld [vmem:[%s720_s5 + $0x10] sm:$0xff]   ;;  %v517_v21 = vld [vmem:[%s720_s5 + $0x18] sm:$0xff]  }
  0x18   :  { %464 = vmatpush3.bf16.msra.mxu1 %v510_v12  ;;  %v518_v22 = vld [vmem:[%s720_s5 + $0x20] sm:$0xff]   ;;  %v519_v23 = vld [vmem:[%s720_s5 + $0x28] sm:$0xff]   ;;  %v520_v32 = vld [vmem:[%s720_s5 + $0x30] sm:$0xff]  }
  0x19   :  { %465 = vmatprep.subr.bf16.mxu1 %v546_v1  ;;  %v381_v24 = vld [vmem:[%s717_s2] ss:$0 sm:$0xff]  ;;  %v521_v33 = vld [vmem:[%s720_s5 + $0x38] sm:$0xff]  }
  0x1a   :  { %448 = vmatpush3.bf16.msra.mxu0 %v504_v11  ;;  %v390_v34 = vld [vmem:[%s719_s4] ss:$0 sm:$0xff]  ;;  %s522_s4 = scalar_lea.vmem %s374_s1, 128 }
  0x1b   :  { %449 = vmatprep.subr.bf16.mxu0 %v546_v1  ;;  %v399_v42 = vld [vmem:[%s721_s6] ss:$0 sm:$0xff]  ;;  %p523_p0 = scmp.ne.s32.totalorder %s374_s1, %s522_s4  ;;  %p528_p2 = scmp.lt.s32.totalorder %s522_s4, %s522_s4 }
  0x1c   :  { %466 = vmatpush3.bf16.msra.mxu1 %v511_v14 }
  0x1d   :  { %467 = vmatprep.subr.bf16.mxu1 %v546_v1  ;;  %p529_p3 = por %p528_p2, %p527_p1 }
  0x1e   :  { %450 = vmatpush3.bf16.msra.mxu0 %v505_v13 }
  0x1f   :  { %475 = vmatprep.subr.bf16.mxu0 %v546_v1  ;;  %p530_p4 = pnand %p529_p3, %p523_p0 }
  0x20   :  { %468 = vmatpush3.bf16.msra.mxu1 %v512_v16 }
  0x21   :  { %452 = vmatmul.mubr.bf16.vlgmr.msra.gmra.mrb[0].mxu0 %v28_v15  ;;  %469 = vmatprep.subr.bf16.mxu1 %v546_v1 }
  0x22   :  { %491 = vmatprep.mubr.msk.bf16.mxu0 %vm547_vm0, %v546_v1  ;;  %476 = vmatpush3.bf16.msra.mxu0 %v514_v18 }
  0x23   :  { %477 = vmatprep.subr.bf16.mxu0 %v546_v1 }
  0x24   :  { %470 = vmatpush3.bf16.msra.mxu1 %v513_v17 }
  0x26   :  { %478 = vmatpush3.bf16.msra.mxu0 %v515_v19 }
  0x27   :  { %479 = vmatprep.subr.bf16.mxu0 %v546_v1 }
  0x2a   :  { %480 = vmatpush3.bf16.msra.mxu0 %v516_v20 }
  0x2b   :  { %481 = vmatprep.subr.bf16.mxu0 %v546_v1 }
  0x2e   :  { %482 = vmatpush3.bf16.msra.mxu0 %v517_v21 }
  0x2f   :  { %483 = vmatprep.subr.bf16.mxu0 %v546_v1 }
  0x32   :  { %484 = vmatpush3.bf16.msra.mxu0 %v518_v22 }
  0x33   :  { %485 = vmatprep.subr.bf16.mxu0 %v546_v1 }
  0x36   :  { %486 = vmatpush3.bf16.msra.mxu0 %v519_v23 }
  0x37   :  { %487 = vmatprep.subr.bf16.mxu0 %v546_v1 }
  0x3a   :  { %488 = vmatpush3.bf16.msra.mxu0 %v520_v32 }
  0x3b   :  { %489 = vmatprep.subr.bf16.mxu0 %v546_v1 }
  0x3e   :  { %490 = vmatpush3.bf16.msra.mxu0 %v521_v33 }
  0xf4   :  { %v134_v25 = vpop.f32.mrb[0].mxu0 }
  0xf5   :  { %v135_v26 = vadd.f32 %v381_v24, %v134_v25  ;;  %v453_v27 = vpop.f32.mrb[1].mxu0 }
  0xf6   :  { %v137_v28 = vpop.f32.mrb[2].mxu0 }
  0xf7   :  { %v140_v29 = vmax.f32 %v135_v26, 0.0  ;;  %v454_v30 = vpop.f32.mrb[3].mxu0 }
  0xf9   :  { %v141_v31 = vpack.c.bf16 %v140_v29, %v140_v29 }
  0xfb   :  { %472 = vmatmul.mubr.bf16.vlgmr.msra.gmra.mrb[0].mxu1 %v141_v31 }
 0x1ce   :  { %v247_v35 = vpop.f32.mrb[0].mxu1 }
 0x1cf   :  { %v248_v36 = vadd.f32 %v390_v34, %v247_v35  ;;  %v473_v37 = vpop.f32.mrb[1].mxu1 }
 0x1d0   :  { %v250_v38 = vpop.f32.mrb[2].mxu1 }
 0x1d1   :  { %v253_v39 = vmax.f32 %v248_v36, 0.0  ;;  %v474_v40 = vpop.f32.mrb[3].mxu1 }
 0x1d3   :  { %v254_v41 = vpack.c.bf16 %v253_v39, %v253_v39 }
 0x1d5   :  { %492 = vmatmul.mubr.bf16.vlgmr.msra.gmra.mrb[4].mxu0 %v254_v41 }
 0x2a8   :  { %v360_v43 = vpop.f32.mrb[4].mxu0 }
 0x2a9   :  { %v361_v44 = vadd.f32 %v399_v42, %v360_v43  ;;  %v493_v45 = vpop.f32.mrb[5].mxu0 }
 0x2aa   :  { %v363_v46 = vpop.f32.mrb[6].mxu0 }
 0x2ab   :  { %366 = vst [vmem:[#allocation2] sm:$0xff] %v361_v44  ;;  %v494_v47 = vpop.f32.mrb[7].mxu0 }
 0x2ac   :  { %533 = shalt.err (!%p530_p4)
}
 0x2ad   :  { %s534_s6 = scalar_lea.hbm %s722_s7, 128 }
 0x2ae   :  { %p535_p5 = scmp.ne.s32.totalorder %s722_s7, %s534_s6  ;;  %p538_p6 = scmp.lt.u32.totalorder %s534_s6, %s722_s7 }
 0x2b0   :  { %p540_p7 = pnand %p538_p6, %p535_p5 }
 0x2b2   :  { %543 = shalt.err (!%p540_p7)
}
 0x2b3   :  { %376 = dma.vmem_to_hbm [thread:$0]  %s374_s1, 128, %s722_s7, [#allocation3]  }
 0x2b4   :  { %544 = dma.done.wait [#allocation3], 128  }
 0x2b5   :  { %545 = vsyncadd [#allocation3], 4294967168 }
 0x2b6   :  { %380 = vsyncpa [#allocation3], 1 }

</bundles_post_ra>
